<compile_context>
chip_gen: v7x
topology: tpu7x:2x2x1
jax: 0.10.0
libtpu: 0.0.40
codegen_flags: <defaults>
</compile_context>

<pallas_src>
import functools

import jax
import jax.numpy as jnp
from jax.experimental import pallas as pl
from jax.experimental.pallas import tpu as pltpu

_NEG = -1e30  # bias for padded logit lanes -> exp() == 0 in log_softmax


def _round_up(x, m):
    return ((x + m - 1) // m) * m


def _pick_tile(n):
    """Row/K tile for streaming A_norm: 1024 on 128-MiB-VMEM parts (v5e/v6e),
    512 on 64-MiB parts (v7x); never bigger than the (128-padded) problem."""
    try:
        vmem = getattr(pltpu.get_tpu_info(), "vmem_capacity_bytes", 64 << 20)
    except Exception:
        vmem = 64 << 20
    base = 1024 if vmem >= (100 << 20) else 512
    return min(base, _round_up(n, 128))


# ---------------------------------------------------------------------------
# Kernel 1: one GCN aggregation layer   o = relu(A_norm @ H + b)
# ---------------------------------------------------------------------------
def _agg_relu_kernel(a_ref, h_ref, b_ref, o_ref, acc_ref):
    k = pl.program_id(1)

    @pl.when(k == 0)
    def _():
        acc_ref[...] = jnp.zeros_like(acc_ref)

    acc_ref[...] += jnp.dot(a_ref[...], h_ref[...],
                            preferred_element_type=jnp.float32)

    @pl.when(k == pl.num_programs(1) - 1)
    def _():
        # element-wise epilogue in f32 (v5e has no bf16 VPU path)
        o_ref[...] = jnp.maximum(acc_ref[...] + b_ref[...], 0.0).astype(o_ref.dtype)


def _aggregate_relu(a_p, h_p, b_p, tile_n, out_dtype):
    n_pad = a_p.shape[0]
    f_pad = h_p.shape[1]
    grid = (n_pad // tile_n, n_pad // tile_n)
    return pl.pallas_call(
        _agg_relu_kernel,
        out_shape=jax.ShapeDtypeStruct((n_pad, f_pad), out_dtype),
        grid_spec=pltpu.PrefetchScalarGridSpec(
            num_scalar_prefetch=0,
            grid=grid,
            in_specs=[
                pl.BlockSpec((tile_n, tile_n), lambda i, k: (i, k)),  # A tile (streamed)
                pl.BlockSpec((tile_n, f_pad), lambda i, k: (k, 0)),   # H row block
                pl.BlockSpec((1, f_pad), lambda i, k: (0, 0)),        # bias
            ],
            out_specs=pl.BlockSpec((tile_n, f_pad), lambda i, k: (i, 0)),
            scratch_shapes=[pltpu.VMEM((tile_n, f_pad), jnp.float32)],
        ),
        compiler_params=pltpu.CompilerParams(
            dimension_semantics=("parallel", "arbitrary")),
    )(a_p, h_p, b_p)


# ---------------------------------------------------------------------------
# Kernel 2: second GCN aggregation with fused Linear + log_softmax finalize
#   o = log_softmax( relu(A_norm @ H + b2) @ W3 + b3 )
# W3/b3 are lane-padded to 128 so the output store is lane-dense.
# ---------------------------------------------------------------------------
def _agg_relu_linear_lsm_kernel(a_ref, h_ref, b2_ref, w3_ref, b3_ref,
                                o_ref, acc_ref):
    k = pl.program_id(1)

    @pl.when(k == 0)
    def _():
        acc_ref[...] = jnp.zeros_like(acc_ref)

    acc_ref[...] += jnp.dot(a_ref[...], h_ref[...],
                            preferred_element_type=jnp.float32)

    @pl.when(k == pl.num_programs(1) - 1)
    def _():
        h = jnp.maximum(acc_ref[...] + b2_ref[...], 0.0)                 # f32
        logits = jnp.dot(h, w3_ref[...],
                         preferred_element_type=jnp.float32) + b3_ref[...]
        m = jnp.max(logits, axis=-1, keepdims=True)
        s = logits - m
        lse = jnp.log(jnp.sum(jnp.exp(s), axis=-1, keepdims=True))
        o_ref[...] = s - lse


def _aggregate_relu_linear_lsm(a_p, h_p, b2_p, w3_p, b3_p, tile_n):
    n_pad = a_p.shape[0]
    f_pad = h_p.shape[1]
    out_pad = w3_p.shape[1]
    grid = (n_pad // tile_n, n_pad // tile_n)
    return pl.pallas_call(
        _agg_relu_linear_lsm_kernel,
        out_shape=jax.ShapeDtypeStruct((n_pad, out_pad), jnp.float32),
        grid_spec=pltpu.PrefetchScalarGridSpec(
            num_scalar_prefetch=0,
            grid=grid,
            in_specs=[
                pl.BlockSpec((tile_n, tile_n), lambda i, k: (i, k)),   # A tile
                pl.BlockSpec((tile_n, f_pad), lambda i, k: (k, 0)),    # H row block
                pl.BlockSpec((1, f_pad), lambda i, k: (0, 0)),         # b2
                pl.BlockSpec((f_pad, out_pad), lambda i, k: (0, 0)),   # W3 (padded)
                pl.BlockSpec((1, out_pad), lambda i, k: (0, 0)),       # b3 (padded)
            ],
            out_specs=pl.BlockSpec((tile_n, out_pad), lambda i, k: (i, 0)),
            scratch_shapes=[pltpu.VMEM((tile_n, f_pad), jnp.float32)],
        ),
        compiler_params=pltpu.CompilerParams(
            dimension_semantics=("parallel", "arbitrary")),
    )(a_p, h_p, b2_p, w3_p, b3_p)


# ---------------------------------------------------------------------------
# Wrapper: full SimpleModel03 forward
# ---------------------------------------------------------------------------
@functools.partial(jax.jit, static_argnames=("matmul_dtype", "tile_n"))
def simple_model03_forward(a_norm, x, w1, b1, w2, b2, w3, b3,
                           *, matmul_dtype=jnp.bfloat16, tile_n=None):
    n = x.shape[0]
    hid = w1.shape[1]
    out_dim = w3.shape[1]
    if tile_n is None:
        tile_n = _pick_tile(n)
    n_pad = _round_up(n, tile_n)
    f_pad = _round_up(hid, 128)
    out_pad = _round_up(out_dim, 128)
    f32 = jnp.float32

    # A_norm and streamed node features in matmul_dtype (bf16 by default:
    # halves dominant HBM traffic, native bf16 MXU); f32 accumulation in-kernel.
    a_p = jnp.zeros((n_pad, n_pad), matmul_dtype).at[:n, :n].set(
        a_norm.astype(matmul_dtype))

    # Layer 1 feature transform (tiny) outside the A-streaming loop.
    xw1 = jnp.dot(x.astype(f32), w1.astype(f32), preferred_element_type=f32)
    xw1_p = jnp.zeros((n_pad, f_pad), matmul_dtype).at[:n, :hid].set(
        xw1.astype(matmul_dtype))
    b1_p = jnp.zeros((1, f_pad), f32).at[:, :hid].set(b1.reshape(1, -1).astype(f32))

    h1 = _aggregate_relu(a_p, xw1_p, b1_p, tile_n, matmul_dtype)   # [n_pad, f_pad]

    # Layer 2 feature transform (tiny) outside the A-streaming loop.
    w2_p = jnp.zeros((f_pad, f_pad), f32).at[:hid, :hid].set(w2.astype(f32))
    h1w2 = jnp.dot(h1, w2_p, preferred_element_type=f32).astype(matmul_dtype)
    b2_p = jnp.zeros((1, f_pad), f32).at[:, :hid].set(b2.reshape(1, -1).astype(f32))

    # Final Linear + log_softmax fused in the second kernel's finalize step.
    # Padded logit lanes get a huge negative bias so exp() == 0 there.
    w3_p = jnp.zeros((f_pad, out_pad), f32).at[:hid, :out_dim].set(w3.astype(f32))
    b3_p = jnp.full((1, out_pad), _NEG, f32).at[:, :out_dim].set(
        b3.reshape(1, -1).astype(f32))

    out_p = _aggregate_relu_linear_lsm(a_p, h1w2, b2_p, w3_p, b3_p, tile_n)
    return out_p[:n, :out_dim]


# ---------------------------------------------------------------------------
# Helpers / reference
# ---------------------------------------------------------------------------
def gcn_normalize(adj):
    """A_norm = D^-1/2 (A + I) D^-1/2, as GCNConv's gcn_norm does."""
    n = adj.shape[0]
    a_hat = adj + jnp.eye(n, dtype=adj.dtype)
    deg = jnp.sum(a_hat, axis=1)
    d_inv_sqrt = jnp.where(deg > 0, 1.0 / jnp.sqrt(deg), 0.0)
    return a_hat * d_inv_sqrt[:, None] * d_inv_sqrt[None, :]


def reference_forward(a_norm, x, w1, b1, w2, b2, w3, b3):
    h = jnp.maximum(a_norm @ (x @ w1) + b1, 0.0)
    h = jnp.maximum(a_norm @ (h @ w2) + b2, 0.0)
    logits = h @ w3 + b3
    return jax.nn.log_softmax(logits, axis=-1)


if __name__ == "__main__":
    key = jax.random.PRNGKey(0)
    n_nodes, input_dim, hidden_dim, output_dim = 16, 8, 32, 2
    k_adj, k_x, k_w1, k_w2, k_w3 = jax.random.split(key, 5)

    # Deterministic random symmetric adjacency (no self loops; gcn_normalize adds them).
    raw = jax.random.uniform(k_adj, (n_nodes, n_nodes))
    adj = (raw + raw.T > 1.2).astype(jnp.float32)
    adj = adj * (1.0 - jnp.eye(n_nodes, dtype=jnp.float32))
    a_norm = gcn_normalize(adj)

    x = jax.random.normal(k_x, (n_nodes, input_dim), dtype=jnp.float32)

    # Deterministic parameter init (glorot-ish scaling), biases zero like PyG.
    w1 = jax.random.normal(k_w1, (input_dim, hidden_dim), jnp.float32) / jnp.sqrt(input_dim)
    b1 = jnp.zeros((1, hidden_dim), jnp.float32)
    w2 = jax.random.normal(k_w2, (hidden_dim, hidden_dim), jnp.float32) / jnp.sqrt(hidden_dim)
    b2 = jnp.zeros((1, hidden_dim), jnp.float32)
    w3 = jax.random.normal(k_w3, (hidden_dim, output_dim), jnp.float32) / jnp.sqrt(hidden_dim)
    b3 = jnp.zeros((1, output_dim), jnp.float32)

    ref = reference_forward(a_norm, x, w1, b1, w2, b2, w3, b3)

    # f32 streaming path: tight check against the pure-JAX reference.
    out_f32 = simple_model03_forward(a_norm, x, w1, b1, w2, b2, w3, b3,
                                     matmul_dtype=jnp.float32)
    out_f32 = jax.block_until_ready(out_f32)
    assert out_f32.shape == (n_nodes, output_dim)
    assert jnp.allclose(out_f32, ref, atol=1e-4, rtol=1e-4), "f32 mismatch vs reference"

    # bf16 streaming path (the performance configuration): loose check.
    out_bf16 = simple_model03_forward(a_norm, x, w1, b1, w2, b2, w3, b3,
                                      matmul_dtype=jnp.bfloat16)
    out_bf16 = jax.block_until_ready(out_bf16)
    assert out_bf16.shape == (n_nodes, output_dim)
    assert jnp.allclose(out_bf16, ref, atol=1e-1, rtol=1e-1), "bf16 mismatch vs reference"

    print("KERNEL_OK")
</pallas_src>

<mosaic_0001>
module attributes {stable_mosaic.version = 11 : i64} {
  func.func @_agg_relu_kernel(%arg0: i32, %arg1: i32, %arg2: memref<128x128xf32, #tpu.memory_space<vmem>>, %arg3: memref<128x128xf32, #tpu.memory_space<vmem>>, %arg4: memref<1x128xf32, #tpu.memory_space<vmem>>, %arg5: memref<128x128xf32, #tpu.memory_space<vmem>>, %arg6: memref<128x128xf32, #tpu.memory_space<vmem>>) attributes {dimension_semantics = [#tpu.dimension_semantics<parallel>, #tpu.dimension_semantics<arbitrary>], iteration_bounds = array<i64: 1, 1>, scalar_prefetch = 0 : i64, scratch_operands = 1 : i64, tpu.core_type = #tpu.core_type<tc>, window_params = [{transform_indices = @transform_0, window_bounds = array<i64: 128, 128>}, {transform_indices = @transform_1, window_bounds = array<i64: 128, 128>}, {pipeline_mode = #tpu.pipeline_mode<synchronous>, transform_indices = @transform_2, window_bounds = array<i64: 1, 128>}, {transform_indices = @transform_3, window_bounds = array<i64: 128, 128>}]} {
    %c0_i32 = arith.constant 0 : i32
    %0 = arith.cmpi eq, %arg1, %c0_i32 : i32
    %1 = arith.extui %0 : i1 to i32
    %c0_i32_0 = arith.constant 0 : i32
    %2 = arith.cmpi ne, %1, %c0_i32_0 : i32
    scf.if %2 {
      %cst_10 = arith.constant 0.000000e+00 : f32
      %12 = vector.broadcast %cst_10 : f32 to vector<128x128xf32>
      %c0_11 = arith.constant 0 : index
      %c0_12 = arith.constant 0 : index
      %13 = vector.load %arg6[%c0_11, %c0_12] : memref<128x128xf32, #tpu.memory_space<vmem>>, vector<128x128xf32>
      tpu.vector_store %arg6[%c0_11, %c0_12], %12 {strides = array<i32>} : memref<128x128xf32, #tpu.memory_space<vmem>>, vector<128x128xf32>,
    } else {
    }
    %c0 = arith.constant 0 : index
    %c0_1 = arith.constant 0 : index
    %3 = vector.load %arg6[%c0, %c0_1] : memref<128x128xf32, #tpu.memory_space<vmem>>, vector<128x128xf32>
    %c0_2 = arith.constant 0 : index
    %c0_3 = arith.constant 0 : index
    %4 = vector.load %arg2[%c0_2, %c0_3] : memref<128x128xf32, #tpu.memory_space<vmem>>, vector<128x128xf32>
    %c0_4 = arith.constant 0 : index
    %c0_5 = arith.constant 0 : index
    %5 = vector.load %arg3[%c0_4, %c0_5] : memref<128x128xf32, #tpu.memory_space<vmem>>, vector<128x128xf32>
    %cst = arith.constant dense<0.000000e+00> : vector<128x128xf32>
    %6 = tpu.matmul %4, %5, %cst {dimension_numbers = #tpu.dot_dimension_numbers<[1], [0], [0], [1], [0, 0, 1, 1], [], []>} : vector<128x128xf32>, vector<128x128xf32>, vector<128x128xf32> -> vector<128x128xf32>
    %7 = arith.addf %3, %6 : vector<128x128xf32>
    %c0_6 = arith.constant 0 : index
    %c0_7 = arith.constant 0 : index
    %8 = vector.load %arg6[%c0_6, %c0_7] : memref<128x128xf32, #tpu.memory_space<vmem>>, vector<128x128xf32>
    tpu.vector_store %arg6[%c0_6, %c0_7], %7 {strides = array<i32>} : memref<128x128xf32, #tpu.memory_space<vmem>>, vector<128x128xf32>,
    %c0_i32_8 = arith.constant 0 : i32
    %9 = arith.cmpi eq, %arg1, %c0_i32_8 : i32
    %10 = arith.extui %9 : i1 to i32
    %c0_i32_9 = arith.constant 0 : i32
    %11 = arith.cmpi ne, %10, %c0_i32_9 : i32
    scf.if %11 {
      %c0_10 = arith.constant 0 : index
      %c0_11 = arith.constant 0 : index
      %12 = vector.load %arg6[%c0_10, %c0_11] : memref<128x128xf32, #tpu.memory_space<vmem>>, vector<128x128xf32>
      %c0_12 = arith.constant 0 : index
      %c0_13 = arith.constant 0 : index
      %13 = vector.load %arg4[%c0_12, %c0_13] : memref<1x128xf32, #tpu.memory_space<vmem>>, vector<1x128xf32>
      %14 = vector.broadcast %13 : vector<1x128xf32> to vector<128x128xf32>
      %15 = arith.addf %12, %14 : vector<128x128xf32>
      %cst_14 = arith.constant 0.000000e+00 : f32
      %16 = vector.broadcast %cst_14 : f32 to vector<128x128xf32>
      %17 = arith.maximumf %15, %16 : vector<128x128xf32>
      %c0_15 = arith.constant 0 : index
      %c0_16 = arith.constant 0 : index
      %18 = vector.load %arg5[%c0_15, %c0_16] : memref<128x128xf32, #tpu.memory_space<vmem>>, vector<128x128xf32>
      tpu.vector_store %arg5[%c0_15, %c0_16], %17 {strides = array<i32>} : memref<128x128xf32, #tpu.memory_space<vmem>>, vector<128x128xf32>,
    } else {
    }
    return
  }
  func.func @transform_0(%arg0: i32, %arg1: i32) -> (i32, i32) {
    %c0_i32 = arith.constant 0 : i32
    return %arg0, %arg1 : i32, i32
  }
  func.func @transform_1(%arg0: i32, %arg1: i32) -> (i32, i32) {
    %c0_i32 = arith.constant 0 : i32
    %c0_i32_0 = arith.constant 0 : i32
    return %arg1, %c0_i32 : i32, i32
  }
  func.func @transform_2(%arg0: i32, %arg1: i32) -> (i32, i32) {
    %c0_i32 = arith.constant 0 : i32
    %c0_i32_0 = arith.constant 0 : i32
    %c0_i32_1 = arith.constant 0 : i32
    return %c0_i32, %c0_i32_0 : i32, i32
  }
  func.func @transform_3(%arg0: i32, %arg1: i32) -> (i32, i32) {
    %c0_i32 = arith.constant 0 : i32
    %c0_i32_0 = arith.constant 0 : i32
    return %arg0, %c0_i32 : i32, i32
  }
}

module attributes {stable_mosaic.version = 11 : i64} {
  func.func @_agg_relu_linear_lsm_kernel(%arg0: i32, %arg1: i32, %arg2: memref<128x128xf32, #tpu.memory_space<vmem>>, %arg3: memref<128x128xf32, #tpu.memory_space<vmem>>, %arg4: memref<1x128xf32, #tpu.memory_space<vmem>>, %arg5: memref<128x128xf32, #tpu.memory_space<vmem>>, %arg6: memref<1x128xf32, #tpu.memory_space<vmem>>, %arg7: memref<128x128xf32, #tpu.memory_space<vmem>>, %arg8: memref<128x128xf32, #tpu.memory_space<vmem>>) attributes {dimension_semantics = [#tpu.dimension_semantics<parallel>, #tpu.dimension_semantics<arbitrary>], iteration_bounds = array<i64: 1, 1>, scalar_prefetch = 0 : i64, scratch_operands = 1 : i64, tpu.core_type = #tpu.core_type<tc>, window_params = [{transform_indices = @transform_0, window_bounds = array<i64: 128, 128>}, {transform_indices = @transform_1, window_bounds = array<i64: 128, 128>}, {pipeline_mode = #tpu.pipeline_mode<synchronous>, transform_indices = @transform_2, window_bounds = array<i64: 1, 128>}, {pipeline_mode = #tpu.pipeline_mode<synchronous>, transform_indices = @transform_3, window_bounds = array<i64: 128, 128>}, {pipeline_mode = #tpu.pipeline_mode<synchronous>, transform_indices = @transform_4, window_bounds = array<i64: 1, 128>}, {transform_indices = @transform_5, window_bounds = array<i64: 128, 128>}]} {
    %c0_i32 = arith.constant 0 : i32
    %0 = arith.cmpi eq, %arg1, %c0_i32 : i32
    %1 = arith.extui %0 : i1 to i32
    %c0_i32_0 = arith.constant 0 : i32
    %2 = arith.cmpi ne, %1, %c0_i32_0 : i32
    scf.if %2 {
      %cst_10 = arith.constant 0.000000e+00 : f32
      %12 = vector.broadcast %cst_10 : f32 to vector<128x128xf32>
      %c0_11 = arith.constant 0 : index
      %c0_12 = arith.constant 0 : index
      %13 = vector.load %arg8[%c0_11, %c0_12] : memref<128x128xf32, #tpu.memory_space<vmem>>, vector<128x128xf32>
      tpu.vector_store %arg8[%c0_11, %c0_12], %12 {strides = array<i32>} : memref<128x128xf32, #tpu.memory_space<vmem>>, vector<128x128xf32>,
    } else {
    }
    %c0 = arith.constant 0 : index
    %c0_1 = arith.constant 0 : index
    %3 = vector.load %arg8[%c0, %c0_1] : memref<128x128xf32, #tpu.memory_space<vmem>>, vector<128x128xf32>
    %c0_2 = arith.constant 0 : index
    %c0_3 = arith.constant 0 : index
    %4 = vector.load %arg2[%c0_2, %c0_3] : memref<128x128xf32, #tpu.memory_space<vmem>>, vector<128x128xf32>
    %c0_4 = arith.constant 0 : index
    %c0_5 = arith.constant 0 : index
    %5 = vector.load %arg3[%c0_4, %c0_5] : memref<128x128xf32, #tpu.memory_space<vmem>>, vector<128x128xf32>
    %cst = arith.constant dense<0.000000e+00> : vector<128x128xf32>
    %6 = tpu.matmul %4, %5, %cst {dimension_numbers = #tpu.dot_dimension_numbers<[1], [0], [0], [1], [0, 0, 1, 1], [], []>} : vector<128x128xf32>, vector<128x128xf32>, vector<128x128xf32> -> vector<128x128xf32>
    %7 = arith.addf %3, %6 : vector<128x128xf32>
    %c0_6 = arith.constant 0 : index
    %c0_7 = arith.constant 0 : index
    %8 = vector.load %arg8[%c0_6, %c0_7] : memref<128x128xf32, #tpu.memory_space<vmem>>, vector<128x128xf32>
    tpu.vector_store %arg8[%c0_6, %c0_7], %7 {strides = array<i32>} : memref<128x128xf32, #tpu.memory_space<vmem>>, vector<128x128xf32>,
    %c0_i32_8 = arith.constant 0 : i32
    %9 = arith.cmpi eq, %arg1, %c0_i32_8 : i32
    %10 = arith.extui %9 : i1 to i32
    %c0_i32_9 = arith.constant 0 : i32
    %11 = arith.cmpi ne, %10, %c0_i32_9 : i32
    scf.if %11 {
      %c0_10 = arith.constant 0 : index
      %c0_11 = arith.constant 0 : index
      %12 = vector.load %arg8[%c0_10, %c0_11] : memref<128x128xf32, #tpu.memory_space<vmem>>, vector<128x128xf32>
      %c0_12 = arith.constant 0 : index
      %c0_13 = arith.constant 0 : index
      %13 = vector.load %arg4[%c0_12, %c0_13] : memref<1x128xf32, #tpu.memory_space<vmem>>, vector<1x128xf32>
      %14 = vector.broadcast %13 : vector<1x128xf32> to vector<128x128xf32>
      %15 = arith.addf %12, %14 : vector<128x128xf32>
      %cst_14 = arith.constant 0.000000e+00 : f32
      %16 = vector.broadcast %cst_14 : f32 to vector<128x128xf32>
      %17 = arith.maximumf %15, %16 : vector<128x128xf32>
      %c0_15 = arith.constant 0 : index
      %c0_16 = arith.constant 0 : index
      %18 = vector.load %arg5[%c0_15, %c0_16] : memref<128x128xf32, #tpu.memory_space<vmem>>, vector<128x128xf32>
      %cst_17 = arith.constant dense<0.000000e+00> : vector<128x128xf32>
      %19 = tpu.matmul %17, %18, %cst_17 {dimension_numbers = #tpu.dot_dimension_numbers<[1], [0], [0], [1], [0, 0, 1, 1], [], []>} : vector<128x128xf32>, vector<128x128xf32>, vector<128x128xf32> -> vector<128x128xf32>
      %c0_18 = arith.constant 0 : index
      %c0_19 = arith.constant 0 : index
      %20 = vector.load %arg6[%c0_18, %c0_19] : memref<1x128xf32, #tpu.memory_space<vmem>>, vector<1x128xf32>
      %21 = vector.broadcast %20 : vector<1x128xf32> to vector<128x128xf32>
      %22 = arith.addf %19, %21 : vector<128x128xf32>
      %cst_20 = arith.constant dense<0xFF800000> : vector<128xf32>
      %23 = vector.multi_reduction <maximumf>, %22, %cst_20 [1] : vector<128x128xf32> to vector<128xf32>
      %24 = vector.shape_cast %23 : vector<128xf32> to vector<128x1xf32>
      %25 = vector.broadcast %24 : vector<128x1xf32> to vector<128x128xf32>
      %26 = arith.subf %22, %25 : vector<128x128xf32>
      %27 = math.exp %26 : vector<128x128xf32>
      %cst_21 = arith.constant dense<0.000000e+00> : vector<128xf32>
      %28 = vector.multi_reduction <add>, %27, %cst_21 [1] : vector<128x128xf32> to vector<128xf32>
      %29 = vector.shape_cast %28 : vector<128xf32> to vector<128x1xf32>
      %30 = math.log %29 : vector<128x1xf32>
      %31 = vector.broadcast %30 : vector<128x1xf32> to vector<128x128xf32>
      %32 = arith.subf %26, %31 : vector<128x128xf32>
      %c0_22 = arith.constant 0 : index
      %c0_23 = arith.constant 0 : index
      %33 = vector.load %arg7[%c0_22, %c0_23] : memref<128x128xf32, #tpu.memory_space<vmem>>, vector<128x128xf32>
      tpu.vector_store %arg7[%c0_22, %c0_23], %32 {strides = array<i32>} : memref<128x128xf32, #tpu.memory_space<vmem>>, vector<128x128xf32>,
    } else {
    }
    return
  }
  func.func @transform_0(%arg0: i32, %arg1: i32) -> (i32, i32) {
    %c0_i32 = arith.constant 0 : i32
    return %arg0, %arg1 : i32, i32
  }
  func.func @transform_1(%arg0: i32, %arg1: i32) -> (i32, i32) {
    %c0_i32 = arith.constant 0 : i32
    %c0_i32_0 = arith.constant 0 : i32
    return %arg1, %c0_i32 : i32, i32
  }
  func.func @transform_2(%arg0: i32, %arg1: i32) -> (i32, i32) {
    %c0_i32 = arith.constant 0 : i32
    %c0_i32_0 = arith.constant 0 : i32
    %c0_i32_1 = arith.constant 0 : i32
    return %c0_i32, %c0_i32_0 : i32, i32
  }
  func.func @transform_3(%arg0: i32, %arg1: i32) -> (i32, i32) {
    %c0_i32 = arith.constant 0 : i32
    %c0_i32_0 = arith.constant 0 : i32
    %c0_i32_1 = arith.constant 0 : i32
    return %c0_i32, %c0_i32_0 : i32, i32
  }
  func.func @transform_4(%arg0: i32, %arg1: i32) -> (i32, i32) {
    %c0_i32 = arith.constant 0 : i32
    %c0_i32_0 = arith.constant 0 : i32
    %c0_i32_1 = arith.constant 0 : i32
    return %c0_i32, %c0_i32_0 : i32, i32
  }
  func.func @transform_5(%arg0: i32, %arg1: i32) -> (i32, i32) {
    %c0_i32 = arith.constant 0 : i32
    %c0_i32_0 = arith.constant 0 : i32
    return %arg0, %c0_i32 : i32, i32
  }
}

</mosaic_0001>

<bundles_post_ra>
// kernel: simple_model03_forward.2
= control target key start
LH: loop header
LB: loop body
LE: loop exit
PB: predicated region body
PF: predicated region fallthrough
CT: control target
= control target key end

     0   :  { %s641_s1 = inlined_call_operand.vmem [shape: f32[128,128], index: 1, kind: input, shape index: {}]   ;;  %s642_s0 = inlined_call_operand.vmem [shape: f32[128,128], index: 0, kind: input, shape index: {}]   ;;  %s643_s2 = inlined_call_operand.vmem [shape: f32[1,128], index: 2, kind: input, shape index: {}]   ;;  %s644_s3 = inlined_call_operand.vmem [shape: f32[128,128], index: 3, kind: output, shape index: {}]  }
   0x1   :  { %v66_v0 = vld [vmem:[%s641_s1] sm:$0xff]  ;;  %v67_v1 = vld [vmem:[%s641_s1 + $0x8] sm:$0xff]  ;;  %v68_v2 = vld [vmem:[%s641_s1 + $0x10] sm:$0xff] }
   0x2   :  { %v426_v3 = vpack.c.bf16 %v67_v1, %v66_v0  ;;  %v69_v4 = vld [vmem:[%s641_s1 + $0x18] sm:$0xff]  ;;  %v70_v6 = vld [vmem:[%s641_s1 + $0x20] sm:$0xff]  ;;  %v71_v7 = vld [vmem:[%s641_s1 + $0x28] sm:$0xff] }
   0x3   :  { %v430_v5 = vpack.c.bf16 %v69_v4, %v68_v2  ;;  %v434_v8 = vpack.c.bf16 %v71_v7, %v70_v6  ;;  %v50_v9 = vld [vmem:[%s642_s0] sm:$0xff]  ;;  %v72_v11 = vld [vmem:[%s641_s1 + $0x30] sm:$0xff]  ;;  %v73_v12 = vld [vmem:[%s641_s1 + $0x38] sm:$0xff] }
   0x4   :  { %427 = vmatprep.subr.bf16.mxu0 %v426_v3  ;;  %458 = vmatprep.subr.bf16.mxu1 %v426_v3  ;;  %v58_v10 = vld [vmem:[%s642_s0 + $0x40] sm:$0xff]  ;;  %v438_v13 = vpack.c.bf16 %v73_v12, %v72_v11  ;;  %v75_v15 = vld [vmem:[%s641_s1 + $0x48] sm:$0xff]  ;;  %v76_v17 = vld [vmem:[%s641_s1 + $0x50] sm:$0xff] }
   0x5   :  { %429 = vmatpush3.bf16.msra.mxu0 %v426_v3  ;;  %466 = vmatpush3.bf16.msra.mxu1 %v426_v3  ;;  %v74_v14 = vld [vmem:[%s641_s1 + $0x40] sm:$0xff]  ;;  %v77_v18 = vld [vmem:[%s641_s1 + $0x58] sm:$0xff]  ;;  %v79_v21 = vld [vmem:[%s641_s1 + $0x68] sm:$0xff] }
   0x6   :  { %431 = vmatprep.subr.bf16.mxu0 %v430_v5  ;;  %459 = vmatprep.subr.bf16.mxu1 %v430_v5  ;;  %v442_v16 = vpack.c.bf16 %v75_v15, %v74_v14  ;;  %v446_v19 = vpack.c.bf16 %v77_v18, %v76_v17  ;;  %v78_v20 = vld [vmem:[%s641_s1 + $0x60] sm:$0xff]  ;;  %v80_v23 = vld [vmem:[%s641_s1 + $0x70] sm:$0xff]  ;;  %v81_v24 = vld [vmem:[%s641_s1 + $0x78] sm:$0xff] }
   0x7   :  { %402 = vmatprep.mubr.f32.mxu0 %v50_v9  ;;  %414 = vmatprep.mubr.f32.mxu1 %v58_v10  ;;  %v450_v22 = vpack.c.bf16 %v79_v21, %v78_v20  ;;  %v454_v25 = vpack.c.bf16 %v81_v24, %v80_v23  ;;  %v51_v26 = vld [vmem:[%s642_s0 + $0x8] sm:$0xff]  ;;  %v52_v28 = vld [vmem:[%s642_s0 + $0x10] sm:$0xff]  ;;  %v53_v30 = vld [vmem:[%s642_s0 + $0x18] sm:$0xff] }
   0x8   :  { %v59_v27 = vld [vmem:[%s642_s0 + $0x48] sm:$0xff]  ;;  %v60_v29 = vld [vmem:[%s642_s0 + $0x50] sm:$0xff]  ;;  %v61_v31 = vld [vmem:[%s642_s0 + $0x58] sm:$0xff] }
   0x9   :  { %433 = vmatpush3.bf16.msra.mxu0 %v430_v5  ;;  %467 = vmatpush3.bf16.msra.mxu1 %v430_v5  ;;  %v54_v32 = vld [vmem:[%s642_s0 + $0x20] sm:$0xff]  ;;  %v55_v34 = vld [vmem:[%s642_s0 + $0x28] sm:$0xff]  ;;  %v56_v36 = vld [vmem:[%s642_s0 + $0x30] sm:$0xff] }
   0xa   :  { %435 = vmatprep.subr.bf16.mxu0 %v434_v8  ;;  %460 = vmatprep.subr.bf16.mxu1 %v434_v8  ;;  %v62_v33 = vld [vmem:[%s642_s0 + $0x60] sm:$0xff]  ;;  %v63_v35 = vld [vmem:[%s642_s0 + $0x68] sm:$0xff]  ;;  %v64_v37 = vld [vmem:[%s642_s0 + $0x70] sm:$0xff] }
   0xb   :  { %v57_v38 = vld [vmem:[%s642_s0 + $0x38] sm:$0xff]  ;;  %v337_v40 = vld [vmem:[%s643_s2] ss:$0 sm:$0xff] }
   0xc   :  { %v65_v39 = vld [vmem:[%s642_s0 + $0x78] sm:$0xff] }
   0xd   :  { %437 = vmatpush3.bf16.msra.mxu0 %v434_v8  ;;  %468 = vmatpush3.bf16.msra.mxu1 %v434_v8 }
   0xe   :  { %439 = vmatprep.subr.bf16.mxu0 %v438_v13  ;;  %461 = vmatprep.subr.bf16.mxu1 %v438_v13 }
  0x11   :  { %441 = vmatpush3.bf16.msra.mxu0 %v438_v13  ;;  %469 = vmatpush3.bf16.msra.mxu1 %v438_v13 }
  0x12   :  { %443 = vmatprep.subr.bf16.mxu0 %v442_v16  ;;  %462 = vmatprep.subr.bf16.mxu1 %v442_v16 }
  0x15   :  { %445 = vmatpush3.bf16.msra.mxu0 %v442_v16  ;;  %470 = vmatpush3.bf16.msra.mxu1 %v442_v16 }
  0x16   :  { %447 = vmatprep.subr.bf16.mxu0 %v446_v19  ;;  %463 = vmatprep.subr.bf16.mxu1 %v446_v19 }
  0x19   :  { %449 = vmatpush3.bf16.msra.mxu0 %v446_v19  ;;  %471 = vmatpush3.bf16.msra.mxu1 %v446_v19 }
  0x1a   :  { %451 = vmatprep.subr.bf16.mxu0 %v450_v22  ;;  %464 = vmatprep.subr.bf16.mxu1 %v450_v22 }
  0x1d   :  { %453 = vmatpush3.bf16.msra.mxu0 %v450_v22  ;;  %472 = vmatpush3.bf16.msra.mxu1 %v450_v22 }
  0x1e   :  { %455 = vmatprep.subr.bf16.mxu0 %v454_v25  ;;  %465 = vmatprep.subr.bf16.mxu1 %v454_v25 }
  0x21   :  { %457 = vmatpush3.bf16.msra.mxu0 %v454_v25  ;;  %473 = vmatpush3.bf16.msra.mxu1 %v454_v25 }
  0x24   :  { %403 = vmatmul.mubr.f32.vlgmr.msra.gmra.mrb[0].mxu0 %v51_v26  ;;  %415 = vmatmul.mubr.f32.vlgmr.msra.gmra.mrb[0].mxu1 %v59_v27 }
  0x25   :  { %405 = vmatprep.mubr.f32.mxu0 %v52_v28  ;;  %417 = vmatprep.mubr.f32.mxu1 %v60_v29 }
  0x28   :  { %406 = vmatmul.mubr.f32.gmra.mrb[2].mxu0 %v53_v30  ;;  %418 = vmatmul.mubr.f32.gmra.mrb[2].mxu1 %v61_v31 }
  0x29   :  { %408 = vmatprep.mubr.f32.mxu0 %v54_v32  ;;  %420 = vmatprep.mubr.f32.mxu1 %v62_v33 }
  0x2c   :  { %409 = vmatmul.mubr.f32.gmra.mrb[4].mxu0 %v55_v34  ;;  %421 = vmatmul.mubr.f32.gmra.mrb[4].mxu1 %v63_v35 }
  0x2d   :  { %411 = vmatprep.mubr.f32.mxu0 %v56_v36  ;;  %423 = vmatprep.mubr.f32.mxu1 %v64_v37 }
  0x30   :  { %412 = vmatmul.mubr.f32.gmra.mrb[6].mxu0 %v57_v38  ;;  %424 = vmatmul.mubr.f32.gmra.mrb[6].mxu1 %v65_v39 }
  0xf7   :  { %v404_v41 = vpop.f32.mrb[0].mxu0  ;;  %v416_v42 = vpop.f32.mrb[0].mxu1 }
  0xf8   :  { %v286_v43 = vadd.f32 %v404_v41, %v337_v40  ;;  %v294_v44 = vadd.f32 %v416_v42, %v337_v40  ;;  %v148_v45 = vpop.f32.mrb[1].mxu0  ;;  %v188_v46 = vpop.f32.mrb[1].mxu1 }
  0xf9   :  { %v285_v47 = vadd.f32 %v337_v40, %v148_v45  ;;  %v293_v48 = vadd.f32 %v337_v40, %v188_v46 }
  0xfa   :  { %v302_v49 = vmax.f32 %v286_v43, 0.0  ;;  %v310_v50 = vmax.f32 %v294_v44, 0.0 }
  0xfb   :  { %v301_v51 = vmax.f32 %v285_v47, 0.0  ;;  %v309_v52 = vmax.f32 %v293_v48, 0.0  ;;  %v407_v53 = vpop.f32.mrb[2].mxu0  ;;  %v419_v54 = vpop.f32.mrb[2].mxu1 }
  0xfc   :  { %318 = vst [vmem:[%s644_s3 + $0x8] sm:$0xff] %v302_v49  ;;  %326 = vst [vmem:[%s644_s3 + $0x48] sm:$0xff] %v310_v50  ;;  %v288_v55 = vadd.f32 %v407_v53, %v337_v40  ;;  %v296_v56 = vadd.f32 %v419_v54, %v337_v40  ;;  %v158_v57 = vpop.f32.mrb[3].mxu0  ;;  %v198_v58 = vpop.f32.mrb[3].mxu1 }
  0xfd   :  { %317 = vst [vmem:[%s644_s3] sm:$0xff] %v301_v51  ;;  %325 = vst [vmem:[%s644_s3 + $0x40] sm:$0xff] %v309_v52  ;;  %v287_v59 = vadd.f32 %v337_v40, %v158_v57  ;;  %v295_v60 = vadd.f32 %v337_v40, %v198_v58 }
  0xfe   :  { %v304_v61 = vmax.f32 %v288_v55, 0.0  ;;  %v312_v62 = vmax.f32 %v296_v56, 0.0 }
  0xff   :  { %v303_v63 = vmax.f32 %v287_v59, 0.0  ;;  %v311_v0 = vmax.f32 %v295_v60, 0.0  ;;  %v410_v1 = vpop.f32.mrb[4].mxu0  ;;  %v422_v2 = vpop.f32.mrb[4].mxu1 }
 0x100   :  { %320 = vst [vmem:[%s644_s3 + $0x18] sm:$0xff] %v304_v61  ;;  %328 = vst [vmem:[%s644_s3 + $0x58] sm:$0xff] %v312_v62  ;;  %v290_v3 = vadd.f32 %v410_v1, %v337_v40  ;;  %v298_v4 = vadd.f32 %v422_v2, %v337_v40  ;;  %v168_v5 = vpop.f32.mrb[5].mxu0  ;;  %v208_v6 = vpop.f32.mrb[5].mxu1 }
 0x101   :  { %319 = vst [vmem:[%s644_s3 + $0x10] sm:$0xff] %v303_v63  ;;  %327 = vst [vmem:[%s644_s3 + $0x50] sm:$0xff] %v311_v0  ;;  %v289_v7 = vadd.f32 %v337_v40, %v168_v5  ;;  %v297_v8 = vadd.f32 %v337_v40, %v208_v6 }
 0x102   :  { %v306_v9 = vmax.f32 %v290_v3, 0.0  ;;  %v314_v10 = vmax.f32 %v298_v4, 0.0 }
 0x103   :  { %v305_v11 = vmax.f32 %v289_v7, 0.0  ;;  %v313_v12 = vmax.f32 %v297_v8, 0.0  ;;  %v413_v13 = vpop.f32.mrb[6].mxu0  ;;  %v425_v14 = vpop.f32.mrb[6].mxu1 }
 0x104   :  { %322 = vst [vmem:[%s644_s3 + $0x28] sm:$0xff] %v306_v9  ;;  %330 = vst [vmem:[%s644_s3 + $0x68] sm:$0xff] %v314_v10  ;;  %v292_v15 = vadd.f32 %v413_v13, %v337_v40  ;;  %v300_v16 = vadd.f32 %v425_v14, %v337_v40  ;;  %v178_v17 = vpop.f32.mrb[7].mxu0  ;;  %v218_v18 = vpop.f32.mrb[7].mxu1 }
 0x105   :  { %321 = vst [vmem:[%s644_s3 + $0x20] sm:$0xff] %v305_v11  ;;  %329 = vst [vmem:[%s644_s3 + $0x60] sm:$0xff] %v313_v12  ;;  %v291_v19 = vadd.f32 %v337_v40, %v178_v17  ;;  %v299_v20 = vadd.f32 %v337_v40, %v218_v18 }
 0x106   :  { %v308_v21 = vmax.f32 %v292_v15, 0.0  ;;  %v316_v22 = vmax.f32 %v300_v16, 0.0 }
 0x107   :  { %v307_v23 = vmax.f32 %v291_v19, 0.0  ;;  %v315_v24 = vmax.f32 %v299_v20, 0.0 }
 0x108   :  { %324 = vst [vmem:[%s644_s3 + $0x38] sm:$0xff] %v308_v21  ;;  %332 = vst [vmem:[%s644_s3 + $0x78] sm:$0xff] %v316_v22 }
 0x109   :  { %323 = vst [vmem:[%s644_s3 + $0x30] sm:$0xff] %v307_v23  ;;  %331 = vst [vmem:[%s644_s3 + $0x70] sm:$0xff] %v315_v24 }

// kernel: simple_model03_forward.3
= control target key start
LH: loop header
LB: loop body
LE: loop exit
PB: predicated region body
PF: predicated region fallthrough
CT: control target
= control target key end

     0   :  { %s1289_s1 = inlined_call_operand.vmem [shape: f32[128,128], index: 1, kind: input, shape index: {}]   ;;  %s1290_s0 = inlined_call_operand.vmem [shape: f32[128,128], index: 0, kind: input, shape index: {}]   ;;  %s1291_s3 = inlined_call_operand.vmem [shape: f32[128,128], index: 3, kind: input, shape index: {}]   ;;  %s1292_s2 = inlined_call_operand.vmem [shape: f32[1,128], index: 2, kind: input, shape index: {}]   ;;  %s1293_s4 = inlined_call_operand.vmem [shape: f32[1,128], index: 4, kind: input, shape index: {}]   ;;  %s1294_s5 = inlined_call_operand.vmem [shape: f32[128,128], index: 5, kind: output, shape index: {}]  }
   0x1   :  { %v72_v0 = vld [vmem:[%s1289_s1] sm:$0xff]  ;;  %v73_v1 = vld [vmem:[%s1289_s1 + $0x8] sm:$0xff]  ;;  %v74_v2 = vld [vmem:[%s1289_s1 + $0x10] sm:$0xff] }
   0x2   :  { %v849_v3 = vpack.c.bf16 %v73_v1, %v72_v0  ;;  %v75_v4 = vld [vmem:[%s1289_s1 + $0x18] sm:$0xff]  ;;  %v76_v6 = vld [vmem:[%s1289_s1 + $0x20] sm:$0xff]  ;;  %v77_v7 = vld [vmem:[%s1289_s1 + $0x28] sm:$0xff] }
   0x3   :  { %v853_v5 = vpack.c.bf16 %v75_v4, %v74_v2  ;;  %v857_v8 = vpack.c.bf16 %v77_v7, %v76_v6  ;;  %v56_v9 = vld [vmem:[%s1290_s0] sm:$0xff]  ;;  %v78_v10 = vld [vmem:[%s1289_s1 + $0x30] sm:$0xff]  ;;  %v79_v11 = vld [vmem:[%s1289_s1 + $0x38] sm:$0xff] }
   0x4   :  { %850 = vmatprep.subr.bf16.mxu0 %v849_v3  ;;  %769 = vmatprep.mubr.f32.mxu0 %v56_v9  ;;  %v861_v12 = vpack.c.bf16 %v79_v11, %v78_v10  ;;  %v80_v13 = vld [vmem:[%s1289_s1 + $0x40] sm:$0xff]  ;;  %v81_v14 = vld [vmem:[%s1289_s1 + $0x48] sm:$0xff]  ;;  %v325_v17 = vld [vmem:[%s1291_s3 + $0x10] sm:$0xff] }
   0x5   :  { %852 = vmatpush3.bf16.msra.mxu0 %v849_v3  ;;  %v323_v15 = vld [vmem:[%s1291_s3] sm:$0xff]  ;;  %v324_v16 = vld [vmem:[%s1291_s3 + $0x8] sm:$0xff]  ;;  %v326_v18 = vld [vmem:[%s1291_s3 + $0x18] sm:$0xff]  ;;  %v865_v21 = vpack.c.bf16 %v81_v14, %v80_v13 }
   0x6   :  { %854 = vmatprep.subr.bf16.mxu0 %v853_v5  ;;  %v881_v19 = vpack.c.bf16 %v324_v16, %v323_v15  ;;  %v885_v20 = vpack.c.bf16 %v326_v18, %v325_v17  ;;  %v327_v22 = vld [vmem:[%s1291_s3 + $0x20] sm:$0xff]  ;;  %v328_v23 = vld [vmem:[%s1291_s3 + $0x28] sm:$0xff]  ;;  %v82_v24 = vld [vmem:[%s1289_s1 + $0x50] sm:$0xff] }
   0x7   :  { %v83_v25 = vld [vmem:[%s1289_s1 + $0x58] sm:$0xff]  ;;  %v889_v26 = vpack.c.bf16 %v328_v23, %v327_v22  ;;  %v329_v28 = vld [vmem:[%s1291_s3 + $0x30] sm:$0xff]  ;;  %v84_v30 = vld [vmem:[%s1289_s1 + $0x60] sm:$0xff] }
   0x8   :  { %882 = vmatprep.subr.bf16.mxu1 %v881_v19  ;;  %v869_v27 = vpack.c.bf16 %v83_v25, %v82_v24  ;;  %v330_v29 = vld [vmem:[%s1291_s3 + $0x38] sm:$0xff]  ;;  %v85_v31 = vld [vmem:[%s1289_s1 + $0x68] sm:$0xff]  ;;  %v331_v34 = vld [vmem:[%s1291_s3 + $0x40] sm:$0xff] }
   0x9   :  { %856 = vmatpush3.bf16.msra.mxu0 %v853_v5  ;;  %884 = vmatpush3.bf16.msra.mxu1 %v881_v19  ;;  %v893_v32 = vpack.c.bf16 %v330_v29, %v329_v28  ;;  %v873_v33 = vpack.c.bf16 %v85_v31, %v84_v30  ;;  %v332_v35 = vld [vmem:[%s1291_s3 + $0x48] sm:$0xff]  ;;  %v86_v36 = vld [vmem:[%s1289_s1 + $0x70] sm:$0xff]  ;;  %v87_v37 = vld [vmem:[%s1289_s1 + $0x78] sm:$0xff] }
   0xa   :  { %858 = vmatprep.subr.bf16.mxu0 %v857_v8  ;;  %886 = vmatprep.subr.bf16.mxu1 %v885_v20  ;;  %v897_v38 = vpack.c.bf16 %v332_v35, %v331_v34  ;;  %v877_v39 = vpack.c.bf16 %v87_v37, %v86_v36  ;;  %v333_v40 = vld [vmem:[%s1291_s3 + $0x50] sm:$0xff]  ;;  %v334_v41 = vld [vmem:[%s1291_s3 + $0x58] sm:$0xff]  ;;  %v335_v43 = vld [vmem:[%s1291_s3 + $0x60] sm:$0xff] }
   0xb   :  { %v901_v42 = vpack.c.bf16 %v334_v41, %v333_v40  ;;  %v336_v44 = vld [vmem:[%s1291_s3 + $0x68] sm:$0xff]  ;;  %v58_v47 = vld [vmem:[%s1290_s0 + $0x10] sm:$0xff]  ;;  %v59_v48 = vld [vmem:[%s1290_s0 + $0x18] sm:$0xff] }
   0xc   :  { %v57_v45 = vld [vmem:[%s1290_s0 + $0x8] sm:$0xff]  ;;  %v905_v46 = vpack.c.bf16 %v336_v44, %v335_v43  ;;  %v60_v49 = vld [vmem:[%s1290_s0 + $0x20] sm:$0xff]  ;;  %v62_v51 = vld [vmem:[%s1290_s0 + $0x30] sm:$0xff] }
   0xd   :  { %860 = vmatpush3.bf16.msra.mxu0 %v857_v8  ;;  %888 = vmatpush3.bf16.msra.mxu1 %v885_v20  ;;  %v61_v50 = vld [vmem:[%s1290_s0 + $0x28] sm:$0xff]  ;;  %v63_v52 = vld [vmem:[%s1290_s0 + $0x38] sm:$0xff]  ;;  %v64_v53 = vld [vmem:[%s1290_s0 + $0x40] sm:$0xff] }
   0xe   :  { %862 = vmatprep.subr.bf16.mxu0 %v861_v12  ;;  %890 = vmatprep.subr.bf16.mxu1 %v889_v26  ;;  %v65_v54 = vld [vmem:[%s1290_s0 + $0x48] sm:$0xff]  ;;  %v66_v55 = vld [vmem:[%s1290_s0 + $0x50] sm:$0xff]  ;;  %v67_v56 = vld [vmem:[%s1290_s0 + $0x58] sm:$0xff] }
   0xf   :  { %v68_v57 = vld [vmem:[%s1290_s0 + $0x60] sm:$0xff]  ;;  %v69_v58 = vld [vmem:[%s1290_s0 + $0x68] sm:$0xff]  ;;  %v70_v59 = vld [vmem:[%s1290_s0 + $0x70] sm:$0xff] }
  0x10   :  { %v71_v60 = vld [vmem:[%s1290_s0 + $0x78] sm:$0xff]  ;;  %v337_v61 = vld [vmem:[%s1291_s3 + $0x70] sm:$0xff]  ;;  %v671_v0 = vld [vmem:[%s1292_s2] ss:$0 sm:$0xff] }
  0x11   :  { %864 = vmatpush3.bf16.msra.mxu0 %v861_v12  ;;  %892 = vmatpush3.bf16.msra.mxu1 %v889_v26  ;;  %v338_v62 = vld [vmem:[%s1291_s3 + $0x78] sm:$0xff] }
  0x12   :  { %866 = vmatprep.subr.bf16.mxu0 %v865_v21  ;;  %894 = vmatprep.subr.bf16.mxu1 %v893_v32  ;;  %v909_v63 = vpack.c.bf16 %v338_v62, %v337_v61 }
  0x15   :  { %868 = vmatpush3.bf16.msra.mxu0 %v865_v21  ;;  %896 = vmatpush3.bf16.msra.mxu1 %v893_v32 }
  0x16   :  { %870 = vmatprep.subr.bf16.mxu0 %v869_v27  ;;  %898 = vmatprep.subr.bf16.mxu1 %v897_v38 }
  0x19   :  { %872 = vmatpush3.bf16.msra.mxu0 %v869_v27  ;;  %900 = vmatpush3.bf16.msra.mxu1 %v897_v38 }
  0x1a   :  { %874 = vmatprep.subr.bf16.mxu0 %v873_v33  ;;  %902 = vmatprep.subr.bf16.mxu1 %v901_v42 }
  0x1d   :  { %876 = vmatpush3.bf16.msra.mxu0 %v873_v33  ;;  %904 = vmatpush3.bf16.msra.mxu1 %v901_v42 }
  0x1e   :  { %878 = vmatprep.subr.bf16.mxu0 %v877_v39  ;;  %906 = vmatprep.subr.bf16.mxu1 %v905_v46 }
  0x21   :  { %880 = vmatpush3.bf16.msra.mxu0 %v877_v39  ;;  %908 = vmatpush3.bf16.msra.mxu1 %v905_v46 }
  0x22   :  { %910 = vmatprep.subr.bf16.mxu1 %v909_v63 }
  0x24   :  { %770 = vmatmul.mubr.f32.vlgmr.msra.gmra.mrb[0].mxu0 %v57_v45 }
  0x25   :  { %772 = vmatprep.mubr.f32.mxu0 %v58_v47  ;;  %912 = vmatpush3.bf16.msra.mxu1 %v909_v63 }
  0x28   :  { %773 = vmatmul.mubr.f32.gmra.mrb[2].mxu0 %v59_v48 }
  0x29   :  { %775 = vmatprep.mubr.f32.mxu0 %v60_v49  ;;  %v672_v49 = vld [vmem:[%s1293_s4] ss:$0 sm:$0xff] }
  0x2c   :  { %776 = vmatmul.mubr.f32.gmra.mrb[4].mxu0 %v61_v50 }
  0x2d   :  { %778 = vmatprep.mubr.f32.mxu0 %v62_v51 }
  0x30   :  { %779 = vmatmul.mubr.f32.gmra.mrb[6].mxu0 %v63_v52 }
  0x31   :  { %781 = vmatprep.mubr.f32.mxu0 %v64_v53 }
  0x34   :  { %782 = vmatmul.mubr.f32.gmra.mrb[8].mxu0 %v65_v54 }
  0x35   :  { %784 = vmatprep.mubr.f32.mxu0 %v66_v55 }
  0x38   :  { %785 = vmatmul.mubr.f32.gmra.mrb[10].mxu0 %v67_v56 }
  0x39   :  { %787 = vmatprep.mubr.f32.mxu0 %v68_v57 }
  0x3c   :  { %788 = vmatmul.mubr.f32.gmra.mrb[12].mxu0 %v69_v58 }
  0x3d   :  { %790 = vmatprep.mubr.f32.mxu0 %v70_v59 }
  0x40   :  { %791 = vmatmul.mubr.f32.gmra.mrb[14].mxu0 %v71_v60 }
  0xf7   :  { %v771_v1 = vpop.f32.mrb[0].mxu0 }
  0xf8   :  { %v292_v2 = vadd.f32 %v771_v1, %v671_v0  ;;  %v154_v3 = vpop.f32.mrb[1].mxu0 }
  0xf9   :  { %v291_v4 = vadd.f32 %v671_v0, %v154_v3 }
  0xfa   :  { %v308_v7 = vmax.f32 %v292_v2, 0.0 }
  0xfb   :  { %v774_v5 = vpop.f32.mrb[2].mxu0  ;;  %v307_v6 = vmax.f32 %v291_v4, 0.0 }
  0xfc   :  { %v294_v8 = vadd.f32 %v774_v5, %v671_v0  ;;  %v164_v9 = vpop.f32.mrb[3].mxu0 }
  0xfd   :  { %v293_v10 = vadd.f32 %v671_v0, %v164_v9  ;;  %825 = vmatprep.mubr.f32.mxu1 %v307_v6 }
  0xfe   :  { %826 = vmatmul.mubr.f32.vlgmr.msra.gmra.mrb[0].mxu1 %v308_v7  ;;  %v310_v13 = vmax.f32 %v294_v8, 0.0 }
  0xff   :  { %v309_v11 = vmax.f32 %v293_v10, 0.0  ;;  %v777_v12 = vpop.f32.mrb[4].mxu0 }
 0x100   :  { %v296_v14 = vadd.f32 %v777_v12, %v671_v0  ;;  %v174_v15 = vpop.f32.mrb[5].mxu0 }
 0x101   :  { %v295_v16 = vadd.f32 %v671_v0, %v174_v15  ;;  %828 = vmatprep.mubr.f32.mxu1 %v309_v11 }
 0x102   :  { %v312_v17 = vmax.f32 %v296_v14, 0.0  ;;  %829 = vmatmul.mubr.f32.gmra.mrb[2].mxu1 %v310_v13 }
 0x103   :  { %v311_v18 = vmax.f32 %v295_v16, 0.0  ;;  %v780_v19 = vpop.f32.mrb[6].mxu0 }
 0x104   :  { %v298_v20 = vadd.f32 %v780_v19, %v671_v0  ;;  %v184_v21 = vpop.f32.mrb[7].mxu0 }
 0x105   :  { %v297_v22 = vadd.f32 %v671_v0, %v184_v21  ;;  %831 = vmatprep.mubr.f32.mxu1 %v311_v18 }
 0x106   :  { %v314_v23 = vmax.f32 %v298_v20, 0.0  ;;  %832 = vmatmul.mubr.f32.gmra.mrb[4].mxu1 %v312_v17 }
 0x107   :  { %v313_v24 = vmax.f32 %v297_v22, 0.0  ;;  %v783_v25 = vpop.f32.mrb[8].mxu0 }
 0x108   :  { %v300_v26 = vadd.f32 %v783_v25, %v671_v0  ;;  %v194_v27 = vpop.f32.mrb[9].mxu0 }
 0x109   :  { %v299_v28 = vadd.f32 %v671_v0, %v194_v27  ;;  %834 = vmatprep.mubr.f32.mxu1 %v313_v24 }
 0x10a   :  { %v316_v29 = vmax.f32 %v300_v26, 0.0  ;;  %835 = vmatmul.mubr.f32.gmra.mrb[6].mxu1 %v314_v23 }
 0x10b   :  { %v315_v30 = vmax.f32 %v299_v28, 0.0  ;;  %v786_v31 = vpop.f32.mrb[10].mxu0 }
 0x10c   :  { %v302_v32 = vadd.f32 %v786_v31, %v671_v0  ;;  %v204_v33 = vpop.f32.mrb[11].mxu0 }
 0x10d   :  { %v301_v34 = vadd.f32 %v671_v0, %v204_v33  ;;  %837 = vmatprep.mubr.f32.mxu1 %v315_v30 }
 0x10e   :  { %v318_v35 = vmax.f32 %v302_v32, 0.0  ;;  %838 = vmatmul.mubr.f32.gmra.mrb[8].mxu1 %v316_v29 }
 0x10f   :  { %v317_v36 = vmax.f32 %v301_v34, 0.0  ;;  %v789_v37 = vpop.f32.mrb[12].mxu0 }
 0x110   :  { %v304_v38 = vadd.f32 %v789_v37, %v671_v0  ;;  %v214_v39 = vpop.f32.mrb[13].mxu0 }
 0x111   :  { %v303_v40 = vadd.f32 %v671_v0, %v214_v39  ;;  %840 = vmatprep.mubr.f32.mxu1 %v317_v36 }
 0x112   :  { %v320_v41 = vmax.f32 %v304_v38, 0.0  ;;  %841 = vmatmul.mubr.f32.gmra.mrb[10].mxu1 %v318_v35 }
 0x113   :  { %v319_v42 = vmax.f32 %v303_v40, 0.0  ;;  %v792_v43 = vpop.f32.mrb[14].mxu0 }
 0x114   :  { %v306_v44 = vadd.f32 %v792_v43, %v671_v0  ;;  %v224_v45 = vpop.f32.mrb[15].mxu0 }
 0x115   :  { %v305_v46 = vadd.f32 %v671_v0, %v224_v45  ;;  %843 = vmatprep.mubr.f32.mxu1 %v319_v42 }
 0x116   :  { %v322_v47 = vmax.f32 %v306_v44, 0.0  ;;  %844 = vmatmul.mubr.f32.gmra.mrb[12].mxu1 %v320_v41 }
 0x117   :  { %v321_v48 = vmax.f32 %v305_v46, 0.0 }
 0x119   :  { %846 = vmatprep.mubr.f32.mxu1 %v321_v48 }
 0x11a   :  { %847 = vmatmul.mubr.f32.gmra.mrb[14].mxu1 %v322_v47 }
 0x1d1   :  { %v827_v50 = vpop.f32.mrb[0].mxu1 }
 0x1d2   :  { %v418_v51 = vadd.f32 %v827_v50, %v672_v49  ;;  %v412_v52 = vpop.f32.mrb[1].mxu1 }
 0x1d3   :  { %v413_v54 = vadd.f32 %v672_v49, %v412_v52 }
 0x1d4   :  { %493 = vmax.xlane.f32.xlu0 %v418_v51 }
 0x1d5   :  { %v830_v53 = vpop.f32.mrb[2].mxu1 }
 0x1d6   :  { %v428_v55 = vadd.f32 %v830_v53, %v672_v49  ;;  %v422_v56 = vpop.f32.mrb[3].mxu1 }
 0x1d7   :  { %v423_v58 = vadd.f32 %v672_v49, %v422_v56 }
 0x1d8   :  { %491 = vmax.xlane.f32.xlu0 %v413_v54  ;;  %497 = vmax.xlane.f32.xlu1 %v428_v55 }
 0x1d9   :  { %v833_v57 = vpop.f32.mrb[4].mxu1 }
 0x1da   :  { %v432_v59 = vpop.f32.mrb[5].mxu1  ;;  %v438_v62 = vadd.f32 %v833_v57, %v672_v49 }
 0x1db   :  { %v433_v60 = vadd.f32 %v672_v49, %v432_v59 }
 0x1dc   :  { %495 = vmax.xlane.f32.xlu1 %v423_v58 }
 0x1dd   :  { %499 = vmax.xlane.f32.xlu0 %v433_v60  ;;  %v836_v61 = vpop.f32.mrb[6].mxu1 }
 0x1de   :  { %v442_v63 = vpop.f32.mrb[7].mxu1  ;;  %v448_v2 = vadd.f32 %v836_v61, %v672_v49 }
 0x1df   :  { %v443_v0 = vadd.f32 %v672_v49, %v442_v63 }
 0x1e0   :  { %501 = vmax.xlane.f32.xlu1 %v438_v62 }
 0x1e1   :  { %503 = vmax.xlane.f32.xlu0 %v443_v0  ;;  %v839_v1 = vpop.f32.mrb[8].mxu1 }
 0x1e2   :  { %v452_v3 = vpop.f32.mrb[9].mxu1  ;;  %v458_v6 = vadd.f32 %v839_v1, %v672_v49 }
 0x1e3   :  { %v453_v4 = vadd.f32 %v672_v49, %v452_v3 }
 0x1e4   :  { %505 = vmax.xlane.f32.xlu1 %v448_v2 }
 0x1e5   :  { %507 = vmax.xlane.f32.xlu0 %v453_v4  ;;  %v842_v5 = vpop.f32.mrb[10].mxu1 }
 0x1e6   :  { %v462_v7 = vpop.f32.mrb[11].mxu1  ;;  %v1157_v10 = vadd.f32 %v842_v5, %v672_v49 }
 0x1e7   :  { %v463_v8 = vadd.f32 %v672_v49, %v462_v7 }
 0x1e8   :  { %509 = vmax.xlane.f32.xlu1 %v458_v6 }
 0x1e9   :  { %511 = vmax.xlane.f32.xlu0 %v463_v8  ;;  %v845_v9 = vpop.f32.mrb[12].mxu1 }
 0x1ea   :  { %v472_v11 = vpop.f32.mrb[13].mxu1  ;;  %v1163_v14 = vadd.f32 %v845_v9, %v672_v49 }
 0x1eb   :  { %v1159_v12 = vadd.f32 %v672_v49, %v472_v11 }
 0x1ec   :  { %513 = vmax.xlane.f32.xlu1 %v1157_v10 }
 0x1ed   :  { %515 = vmax.xlane.f32.xlu0 %v1159_v12  ;;  %v848_v13 = vpop.f32.mrb[14].mxu1 }
 0x1ee   :  { %v482_v15 = vpop.f32.mrb[15].mxu1  ;;  %v1169_v17 = vadd.f32 %v848_v13, %v672_v49 }
 0x1ef   :  { %v1165_v16 = vadd.f32 %v672_v49, %v482_v15 }
 0x1f0   :  { %517 = vmax.xlane.f32.xlu1 %v1163_v14 }
 0x1f1   :  { %519 = vmax.xlane.f32.xlu0 %v1165_v16 }
 0x1f4   :  { %521 = vmax.xlane.f32.xlu1 %v1169_v17 }
 0x261   :  { %v494_v18 = vpop.xlane.xlu0 %493 }
 0x262   :  { %v1172_v19 = vsub.f32 %v418_v51, %v494_v18 }
 0x264   :  { %v541_v20 = vmul.f32 1.442695, %v1172_v19 }
 0x265   :  { %v492_v21 = vpop.xlane.xlu0 %491  ;;  %v498_v22 = vpop.xlane.xlu1 %497 }
 0x266   :  { %913 = vpow2.f32 %v541_v20  ;;  %v1175_v23 = vsub.f32 %v413_v54, %v492_v21  ;;  %v1177_v24 = vsub.f32 %v428_v55, %v498_v22 }
 0x268   :  { %v539_v25 = vmul.f32 1.442695, %v1175_v23  ;;  %v545_v26 = vmul.f32 1.442695, %v1177_v24 }
 0x269   :  { %v496_v27 = vpop.xlane.xlu1 %495 }
 0x26a   :  { %915 = vpow2.f32 %v539_v25  ;;  %v1181_v28 = vsub.f32 %v423_v58, %v496_v27  ;;  %v500_v29 = vpop.xlane.xlu0 %499 }
 0x26b   :  { %917 = vpow2.f32 %v545_v26  ;;  %v1183_v30 = vsub.f32 %v433_v60, %v500_v29 }
 0x26c   :  { %v543_v31 = vmul.f32 1.442695, %v1181_v28 }
 0x26d   :  { %v547_v32 = vmul.f32 1.442695, %v1183_v30  ;;  %v502_v33 = vpop.xlane.xlu1 %501 }
 0x26e   :  { %919 = vpow2.f32 %v543_v31  ;;  %v1187_v34 = vsub.f32 %v438_v62, %v502_v33  ;;  %v504_v35 = vpop.xlane.xlu0 %503 }
 0x26f   :  { %v1189_v36 = vsub.f32 %v443_v0, %v504_v35  ;;  %921 = vpow2.f32 %v547_v32 }
 0x270   :  { %v914_v37 = vpop.eup %913  ;;  %v549_v38 = vmul.f32 1.442695, %v1187_v34 }
 0x271   :  { %v551_v39 = vmul.f32 1.442695, %v1189_v36  ;;  %v506_v40 = vpop.xlane.xlu1 %505  ;;  %573 = vadd.xlane.f32.xlu1 %v914_v37 }
 0x272   :  { %923 = vpow2.f32 %v549_v38  ;;  %v1193_v41 = vsub.f32 %v448_v2, %v506_v40  ;;  %v508_v42 = vpop.xlane.xlu0 %507 }
 0x273   :  { %v1195_v43 = vsub.f32 %v453_v4, %v508_v42  ;;  %925 = vpow2.f32 %v551_v39 }
 0x274   :  { %v916_v44 = vpop.eup %915  ;;  %v553_v45 = vmul.f32 1.442695, %v1193_v41 }
 0x275   :  { %v918_v46 = vpop.eup %917  ;;  %v555_v47 = vmul.f32 1.442695, %v1195_v43  ;;  %v510_v48 = vpop.xlane.xlu1 %509  ;;  %571 = vadd.xlane.f32.xlu0 %v916_v44 }
 0x276   :  { %927 = vpow2.f32 %v553_v45  ;;  %v1199_v49 = vsub.f32 %v458_v6, %v510_v48  ;;  %577 = vadd.xlane.f32.xlu1 %v918_v46  ;;  %v512_v50 = vpop.xlane.xlu0 %511 }
 0x277   :  { %v1201_v51 = vsub.f32 %v463_v8, %v512_v50  ;;  %929 = vpow2.f32 %v555_v47 }
 0x278   :  { %v920_v52 = vpop.eup %919  ;;  %v557_v53 = vmul.f32 1.442695, %v1199_v49 }
 0x279   :  { %v559_v54 = vmul.f32 1.442695, %v1201_v51  ;;  %v514_v55 = vpop.xlane.xlu1 %513  ;;  %575 = vadd.xlane.f32.xlu0 %v920_v52  ;;  %v922_v58 = vpop.eup %921 }
 0x27a   :  { %931 = vpow2.f32 %v557_v53  ;;  %v1206_v56 = vsub.f32 %v1157_v10, %v514_v55  ;;  %v516_v57 = vpop.xlane.xlu0 %515 }
 0x27b   :  { %v1209_v59 = vsub.f32 %v1159_v12, %v516_v57  ;;  %933 = vpow2.f32 %v559_v54 }
 0x27c   :  { %v924_v60 = vpop.eup %923  ;;  %v561_v61 = vmul.f32 1.442695, %v1206_v56 }
 0x27d   :  { %v563_v62 = vmul.f32 1.442695, %v1209_v59  ;;  %v518_v63 = vpop.xlane.xlu1 %517  ;;  %581 = vadd.xlane.f32.xlu1 %v924_v60  ;;  %579 = vadd.xlane.f32.xlu0 %v922_v58  ;;  %v926_v2 = vpop.eup %925 }
 0x27e   :  { %935 = vpow2.f32 %v561_v61  ;;  %v1214_v0 = vsub.f32 %v1163_v14, %v518_v63  ;;  %v520_v1 = vpop.xlane.xlu0 %519 }
 0x27f   :  { %v1217_v3 = vsub.f32 %v1165_v16, %v520_v1  ;;  %937 = vpow2.f32 %v563_v62 }
 0x280   :  { %v928_v4 = vpop.eup %927  ;;  %v565_v5 = vmul.f32 1.442695, %v1214_v0 }
 0x281   :  { %v567_v6 = vmul.f32 1.442695, %v1217_v3  ;;  %585 = vadd.xlane.f32.xlu1 %v928_v4  ;;  %v522_v7 = vpop.xlane.xlu1 %521  ;;  %583 = vadd.xlane.f32.xlu0 %v926_v2  ;;  %v930_v9 = vpop.eup %929 }
 0x282   :  { %939 = vpow2.f32 %v565_v5  ;;  %v1222_v8 = vsub.f32 %v1169_v17, %v522_v7 }
 0x283   :  { %941 = vpow2.f32 %v567_v6 }
 0x284   :  { %v932_v10 = vpop.eup %931  ;;  %v569_v11 = vmul.f32 1.442695, %v1222_v8 }
 0x285   :  { %589 = vadd.xlane.f32.xlu1 %v932_v10  ;;  %587 = vadd.xlane.f32.xlu0 %v930_v9  ;;  %v934_v12 = vpop.eup %933 }
 0x286   :  { %943 = vpow2.f32 %v569_v11 }
 0x288   :  { %v936_v13 = vpop.eup %935 }
 0x289   :  { %593 = vadd.xlane.f32.xlu1 %v936_v13  ;;  %591 = vadd.xlane.f32.xlu0 %v934_v12  ;;  %v938_v14 = vpop.eup %937 }
 0x28c   :  { %v940_v15 = vpop.eup %939 }
 0x28d   :  { %597 = vadd.xlane.f32.xlu1 %v940_v15  ;;  %595 = vadd.xlane.f32.xlu0 %v938_v14  ;;  %v942_v16 = vpop.eup %941 }
 0x290   :  { %v944_v18 = vpop.eup %943 }
 0x291   :  { %601 = vadd.xlane.f32.xlu1 %v944_v18  ;;  %599 = vadd.xlane.f32.xlu0 %v942_v16 }
 0x2fe   :  { %v574_v17 = vpop.xlane.xlu1 %573 }
 0x2ff   :  { %945 = vlog2.f32 %v574_v17 }
 0x302   :  { %v572_v20 = vpop.xlane.xlu0 %571 }
 0x303   :  { %v578_v21 = vpop.xlane.xlu1 %577  ;;  %947 = vlog2.f32 %v572_v20 }
 0x304   :  { %949 = vlog2.f32 %v578_v21 }
 0x306   :  { %v576_v22 = vpop.xlane.xlu0 %575 }
 0x307   :  { %951 = vlog2.f32 %v576_v22 }
 0x309   :  { %v946_v25 = vpop.eup %945 }
 0x30a   :  { %v606_v26 = vmul.f32 0.6931472, %v946_v25  ;;  %v582_v27 = vpop.xlane.xlu1 %581  ;;  %v580_v29 = vpop.xlane.xlu0 %579 }
 0x30b   :  { %953 = vlog2.f32 %v582_v27 }
 0x30c   :  { %v636_v31 = vsub.f32 %v1172_v19, %v606_v26  ;;  %955 = vlog2.f32 %v580_v29 }
 0x30d   :  { %v948_v32 = vpop.eup %947 }
 0x30e   :  { %v950_v33 = vpop.eup %949  ;;  %652 = vst [vmem:[%s1294_s5 + $0x8] sm:$0xff] %v636_v31  ;;  %v604_v35 = vmul.f32 0.6931472, %v948_v32  ;;  %v586_v37 = vpop.xlane.xlu1 %585 }
 0x30f   :  { %v584_v38 = vpop.xlane.xlu0 %583  ;;  %v610_v39 = vmul.f32 0.6931472, %v950_v33  ;;  %957 = vlog2.f32 %v586_v37 }
 0x310   :  { %v635_v40 = vsub.f32 %v1175_v23, %v604_v35  ;;  %959 = vlog2.f32 %v584_v38 }
 0x311   :  { %v952_v42 = vpop.eup %951  ;;  %v638_v44 = vsub.f32 %v1177_v24, %v610_v39 }
 0x312   :  { %651 = vst [vmem:[%s1294_s5] sm:$0xff] %v635_v40  ;;  %v608_v19 = vmul.f32 0.6931472, %v952_v42  ;;  %v590_v45 = vpop.xlane.xlu1 %589 }
 0x313   :  { %v588_v46 = vpop.xlane.xlu0 %587  ;;  %654 = vst [vmem:[%s1294_s5 + $0x18] sm:$0xff] %v638_v44  ;;  %961 = vlog2.f32 %v590_v45 }
 0x314   :  { %v637_v47 = vsub.f32 %v1181_v28, %v608_v19  ;;  %963 = vlog2.f32 %v588_v46 }
 0x315   :  { %v954_v23 = vpop.eup %953 }
 0x316   :  { %v956_v48 = vpop.eup %955  ;;  %653 = vst [vmem:[%s1294_s5 + $0x10] sm:$0xff] %v637_v47  ;;  %v614_v24 = vmul.f32 0.6931472, %v954_v23  ;;  %v594_v50 = vpop.xlane.xlu1 %593 }
 0x317   :  { %v592_v52 = vpop.xlane.xlu0 %591  ;;  %v612_v53 = vmul.f32 0.6931472, %v956_v48  ;;  %965 = vlog2.f32 %v594_v50 }
 0x318   :  { %v640_v54 = vsub.f32 %v1187_v34, %v614_v24  ;;  %967 = vlog2.f32 %v592_v52 }
 0x319   :  { %v958_v55 = vpop.eup %957  ;;  %v639_v57 = vsub.f32 %v1183_v30, %v612_v53 }
 0x31a   :  { %v960_v58 = vpop.eup %959  ;;  %656 = vst [vmem:[%s1294_s5 + $0x28] sm:$0xff] %v640_v54  ;;  %v618_v28 = vmul.f32 0.6931472, %v958_v55  ;;  %v598_v60 = vpop.xlane.xlu1 %597 }
 0x31b   :  { %v596_v61 = vpop.xlane.xlu0 %595  ;;  %655 = vst [vmem:[%s1294_s5 + $0x20] sm:$0xff] %v639_v57  ;;  %v616_v62 = vmul.f32 0.6931472, %v960_v58  ;;  %969 = vlog2.f32 %v598_v60 }
 0x31c   :  { %v642_v34 = vsub.f32 %v1193_v41, %v618_v28  ;;  %971 = vlog2.f32 %v596_v61 }
 0x31d   :  { %v962_v63 = vpop.eup %961  ;;  %v641_v30 = vsub.f32 %v1189_v36, %v616_v62 }
 0x31e   :  { %v964_v1 = vpop.eup %963  ;;  %658 = vst [vmem:[%s1294_s5 + $0x38] sm:$0xff] %v642_v34  ;;  %v622_v2 = vmul.f32 0.6931472, %v962_v63  ;;  %v602_v4 = vpop.xlane.xlu1 %601 }
 0x31f   :  { %v600_v5 = vpop.xlane.xlu0 %599  ;;  %657 = vst [vmem:[%s1294_s5 + $0x30] sm:$0xff] %v641_v30  ;;  %v620_v6 = vmul.f32 0.6931472, %v964_v1  ;;  %973 = vlog2.f32 %v602_v4 }
 0x320   :  { %v644_v41 = vsub.f32 %v1199_v49, %v622_v2  ;;  %975 = vlog2.f32 %v600_v5 }
 0x321   :  { %v966_v7 = vpop.eup %965  ;;  %v643_v36 = vsub.f32 %v1195_v43, %v620_v6 }
 0x322   :  { %v968_v9 = vpop.eup %967  ;;  %660 = vst [vmem:[%s1294_s5 + $0x48] sm:$0xff] %v644_v41  ;;  %v626_v10 = vmul.f32 0.6931472, %v966_v7 }
 0x323   :  { %659 = vst [vmem:[%s1294_s5 + $0x40] sm:$0xff] %v643_v36  ;;  %v624_v11 = vmul.f32 0.6931472, %v968_v9 }
 0x324   :  { %v646_v12 = vsub.f32 %v1206_v56, %v626_v10 }
 0x325   :  { %v970_v13 = vpop.eup %969  ;;  %v645_v49 = vsub.f32 %v1201_v51, %v624_v11 }
 0x326   :  { %v972_v14 = vpop.eup %971  ;;  %662 = vst [vmem:[%s1294_s5 + $0x58] sm:$0xff] %v646_v12  ;;  %v630_v43 = vmul.f32 0.6931472, %v970_v13 }
 0x327   :  { %661 = vst [vmem:[%s1294_s5 + $0x50] sm:$0xff] %v645_v49  ;;  %v628_v15 = vmul.f32 0.6931472, %v972_v14 }
 0x328   :  { %v648_v16 = vsub.f32 %v1214_v0, %v630_v43 }
 0x329   :  { %v974_v18 = vpop.eup %973  ;;  %v647_v17 = vsub.f32 %v1209_v59, %v628_v15 }
 0x32a   :  { %v976_v56 = vpop.eup %975  ;;  %664 = vst [vmem:[%s1294_s5 + $0x68] sm:$0xff] %v648_v16  ;;  %v634_v51 = vmul.f32 0.6931472, %v974_v18 }
 0x32b   :  { %663 = vst [vmem:[%s1294_s5 + $0x60] sm:$0xff] %v647_v17  ;;  %v632_v20 = vmul.f32 0.6931472, %v976_v56 }
 0x32c   :  { %v650_v21 = vsub.f32 %v1222_v8, %v634_v51 }
 0x32d   :  { %v649_v22 = vsub.f32 %v1217_v3, %v632_v20 }
 0x32e   :  { %666 = vst [vmem:[%s1294_s5 + $0x78] sm:$0xff] %v650_v21 }
 0x32f   :  { %665 = vst [vmem:[%s1294_s5 + $0x70] sm:$0xff] %v649_v22 }

</bundles_post_ra>
